<compile_context>
chip_gen: v7x
topology: tpu7x:2x2x1
jax: 0.10.0
libtpu: 0.0.40
codegen_flags: <defaults>
</compile_context>

<pallas_src>
import functools

import jax
import jax.numpy as jnp
from jax.experimental import pallas as pl
from jax.experimental.pallas import tpu as pltpu


def _round_up(a, b):
    return (a + b - 1) // b * b


def _vmem_capacity_bytes():
    """Physical VMEM of the current TPU generation (fallback: 64 MiB, v7x)."""
    try:
        return int(pltpu.get_tpu_info().vmem_capacity_bytes)
    except Exception:  # conservative fallback keeps tiling valid everywhere
        return 64 * 1024 * 1024


# ---------------------------------------------------------------------------
# Kernels.  All tiles are lane-dense (last dim a multiple of 128).
# ---------------------------------------------------------------------------
def _conv_lrelu_kernel(p_ref, w_ref, o_ref, *, slope):
    """bn=False: conv-as-matmul fused with LeakyReLU (single pass)."""
    acc = jnp.dot(p_ref[...], w_ref[...], preferred_element_type=jnp.float32)
    o_ref[...] = jnp.where(acc > 0, acc, slope * acc)


def _partial_stats(acc, psum_ref, psq_ref):
    tm, tn = acc.shape
    r = acc.reshape(tm // 8, 8, tn)          # (8, 128)-tile aligned regroup
    psum_ref[...] = jnp.sum(r, axis=0)       # partial sums reduced tm -> 8 rows
    psq_ref[...] = jnp.sum(r * r, axis=0)


def _conv_stats_store_kernel(p_ref, w_ref, o_ref, psum_ref, psq_ref):
    """bn pass 1 (large K): matmul, bf16 conv intermediate + partial stats."""
    acc = jnp.dot(p_ref[...], w_ref[...], preferred_element_type=jnp.float32)
    o_ref[...] = acc.astype(o_ref.dtype)     # bf16 store; stats stay f32
    _partial_stats(acc, psum_ref, psq_ref)


def _conv_stats_only_kernel(p_ref, w_ref, psum_ref, psq_ref):
    """bn pass 1 (small K): partial stats only, no conv intermediate."""
    acc = jnp.dot(p_ref[...], w_ref[...], preferred_element_type=jnp.float32)
    _partial_stats(acc, psum_ref, psq_ref)


def _scale_shift_lrelu_kernel(y_ref, sc_ref, sh_ref, o_ref, *, slope):
    """bn pass 2 (large K): y*scale + shift -> LeakyReLU (streaming FMA)."""
    yn = y_ref[...].astype(jnp.float32) * sc_ref[...] + sh_ref[...]
    o_ref[...] = jnp.where(yn > 0, yn, slope * yn)


def _conv_scale_shift_lrelu_kernel(p_ref, w_ref, sc_ref, sh_ref, o_ref, *,
                                   slope):
    """bn pass 2 (small K): recompute matmul, then scale/shift + LeakyReLU."""
    acc = jnp.dot(p_ref[...], w_ref[...], preferred_element_type=jnp.float32)
    yn = acc * sc_ref[...] + sh_ref[...]
    o_ref[...] = jnp.where(yn > 0, yn, slope * yn)


# ---------------------------------------------------------------------------
# XLA-side helpers.
# ---------------------------------------------------------------------------
def _im2col(x, ho, wo):
    """x: [N, C_in, H, W] -> patches [N*ho*wo, C_in*16] (k=4, stride 2, pad 1)."""
    n, c_in, _, _ = x.shape
    xp = jnp.pad(x, ((0, 0), (0, 0), (1, 1), (1, 1)))
    cols = []
    for kh in range(4):
        for kw in range(4):
            cols.append(xp[:, :, kh:kh + 2 * ho:2, kw:kw + 2 * wo:2])
    patches = jnp.stack(cols, axis=2)                     # [N, C_in, 16, ho, wo]
    patches = patches.transpose(0, 3, 4, 1, 2).reshape(n * ho * wo, c_in * 16)
    # TODO(synk): gather the 4x4 taps inside the kernel from a padded NHWC
    # input (memory_space=pl.ANY + manual make_async_copy) instead of
    # materializing the ~4x-sized patch matrix in HBM.
    return patches


def _pick_tiles(m, k_pad, c_pad):
    vmem_cap = _vmem_capacity_bytes()
    if vmem_cap >= 100 * (1 << 20):       # v5e / v6e: 128 MiB physical VMEM
        step_budget, vmem_limit = 48 << 20, 64 << 20
    else:                                 # v7x: 64 MiB per TensorCore
        step_budget, vmem_limit = 14 << 20, 32 << 20

    tn = min(c_pad, 256)                  # matches 256-wide MXU on v6e/v7x
    grid_n = c_pad // tn

    m8 = _round_up(m, 8)
    tm = min(1024, m8)

    def step_bytes(t):
        return (2 * t * k_pad * 2         # patches tile, double-buffered bf16
                + 2 * k_pad * tn * 2      # weight tile, double-buffered bf16
                + 2 * t * tn * 4          # widest output tile (f32), 2 buffers
                + 4 * 8 * tn * 4)         # partial-stat blocks

    while tm > 128 and step_bytes(tm) > step_budget:
        tm = _round_up(tm // 2, 8)

    # v7x has 2 TensorCores: make sure the "parallel" grid has >= 2 steps.
    if -(-m8 // tm) * grid_n < 2 and m8 >= 16:
        tm = _round_up(-(-m8 // 2), 8)

    m_pad = _round_up(m, tm)
    return tm, tn, m_pad, m_pad // tm, grid_n, vmem_limit


@functools.partial(jax.jit,
                   static_argnames=("bn", "eps", "slope", "out_layout",
                                    "store_conv"))
def dcgan_discriminator_conv(x, weight, gamma=None, beta=None, *, bn=True,
                             eps=1e-5, slope=0.2, out_layout="NCHW",
                             store_conv=None):
    """Forward pass of DCGanDiscriminatorConv.

    x:      [N, C_in, H, W]  float32 (NCHW, like PyTorch)
    weight: [C_out, C_in, 4, 4] float32 (PyTorch OIHW), conv has no bias.
    Returns [N, C_out, H//2, W//2] (NCHW, default) or [N, H//2, W//2, C_out]
    (out_layout="NHWC", lets a following layer skip the transpose).

    Matmul inputs are cast to bf16 (f32 MXU accumulation) - a deliberate,
    GAN-friendly deviation from the full-f32 PyTorch conv.
    """
    n, c_in, h, w = x.shape
    c_out = weight.shape[0]
    ho, wo = (h + 2 - 4) // 2 + 1, (w + 2 - 4) // 2 + 1
    m = n * ho * wo
    k = c_in * 16

    c_pad = _round_up(c_out, 128)             # lane-dense output channels
    k_pad = _round_up(k, 128)                 # lane-dense contraction dim
    tm, tn, m_pad, grid_m, grid_n, vmem_limit = _pick_tiles(m, k_pad, c_pad)

    # Cast to bf16 BEFORE im2col so the 4x-sized patch producer moves bf16
    # (bit-identical values: pad/slice/stack do not change them).
    patches = _im2col(x.astype(jnp.bfloat16), ho, wo)
    patches = jnp.pad(patches, ((0, m_pad - m), (0, k_pad - k)))
    w_mat = weight.reshape(c_out, k).T.astype(jnp.bfloat16)
    w_mat = jnp.pad(w_mat, ((0, k_pad - k), (0, c_pad - c_out)))

    cparams = pltpu.CompilerParams(
        dimension_semantics=("parallel", "parallel"),
        vmem_limit_bytes=vmem_limit)

    p_spec = pl.BlockSpec((tm, k_pad), lambda i, j: (i, 0))
    w_spec = pl.BlockSpec((k_pad, tn), lambda i, j: (0, j))
    o_spec = pl.BlockSpec((tm, tn), lambda i, j: (i, j))
    s_spec = pl.BlockSpec((8, tn), lambda i, j: (i, j))       # partial stats
    c_spec = pl.BlockSpec((1, tn), lambda i, j: (0, j))       # scale / shift
    grid = (grid_m, grid_n)

    if not bn:
        out_mat = pl.pallas_call(
            functools.partial(_conv_lrelu_kernel, slope=slope),
            out_shape=jax.ShapeDtypeStruct((m_pad, c_pad), jnp.float32),
            grid_spec=pltpu.PrefetchScalarGridSpec(
                num_scalar_prefetch=0, grid=grid,
                in_specs=[p_spec, w_spec], out_specs=o_spec),
            compiler_params=cparams,
        )(patches, w_mat)
    else:
        if store_conv is None:
            # Small-K layers: recomputing the matmul in pass 2 is cheaper than
            # writing + re-reading an (M, C) intermediate.
            store_conv = k_pad > 2 * c_pad

        stats_shape = jax.ShapeDtypeStruct((grid_m * 8, c_pad), jnp.float32)
        if store_conv:
            # ---- pass 1: conv (bf16 intermediate) + partial statistics -----
            conv_bf16, psum, psq = pl.pallas_call(
                _conv_stats_store_kernel,
                out_shape=(jax.ShapeDtypeStruct((m_pad, c_pad), jnp.bfloat16),
                           stats_shape, stats_shape),
                grid_spec=pltpu.PrefetchScalarGridSpec(
                    num_scalar_prefetch=0, grid=grid,
                    in_specs=[p_spec, w_spec],
                    out_specs=(o_spec, s_spec, s_spec)),
                compiler_params=cparams,
            )(patches, w_mat)
        else:
            # ---- pass 1: partial statistics only (no intermediate) ---------
            psum, psq = pl.pallas_call(
                _conv_stats_only_kernel,
                out_shape=(stats_shape, stats_shape),
                grid_spec=pltpu.PrefetchScalarGridSpec(
                    num_scalar_prefetch=0, grid=grid,
                    in_specs=[p_spec, w_spec],
                    out_specs=(s_spec, s_spec)),
                compiler_params=cparams,
            )(patches, w_mat)

        # ---- tiny (1, C) math: fold batch stats + affine into scale/shift --
        if gamma is None:
            gamma = jnp.ones((c_out,), jnp.float32)
        if beta is None:
            beta = jnp.zeros((c_out,), jnp.float32)
        gamma_p = jnp.pad(jnp.asarray(gamma, jnp.float32).reshape(1, c_out),
                          ((0, 0), (0, c_pad - c_out)), constant_values=1.0)
        beta_p = jnp.pad(jnp.asarray(beta, jnp.float32).reshape(1, c_out),
                         ((0, 0), (0, c_pad - c_out)))
        m_f = jnp.float32(m)
        mean = jnp.sum(psum, axis=0, keepdims=True) / m_f
        # One-pass variance in f32; clamp guards cancellation.
        # TODO(synk): switch to centered/compensated partial sums if layer
        # activations ever have |mean| >> std.
        var = jnp.maximum(jnp.sum(psq, axis=0, keepdims=True) / m_f
                          - mean * mean, 0.0)
        inv = jax.lax.rsqrt(var + eps)            # biased var (PyTorch BN)
        scale = gamma_p * inv
        shift = beta_p - mean * scale

        if store_conv:
            # ---- pass 2: scale/shift + LeakyReLU over the bf16 intermediate
            out_mat = pl.pallas_call(
                functools.partial(_scale_shift_lrelu_kernel, slope=slope),
                out_shape=jax.ShapeDtypeStruct((m_pad, c_pad), jnp.float32),
                grid_spec=pltpu.PrefetchScalarGridSpec(
                    num_scalar_prefetch=0, grid=grid,
                    in_specs=[o_spec, c_spec, c_spec], out_specs=o_spec),
                compiler_params=cparams,
            )(conv_bf16, scale, shift)
        else:
            # ---- pass 2: recompute matmul + scale/shift + LeakyReLU --------
            out_mat = pl.pallas_call(
                functools.partial(_conv_scale_shift_lrelu_kernel, slope=slope),
                out_shape=jax.ShapeDtypeStruct((m_pad, c_pad), jnp.float32),
                grid_spec=pltpu.PrefetchScalarGridSpec(
                    num_scalar_prefetch=0, grid=grid,
                    in_specs=[p_spec, w_spec, c_spec, c_spec],
                    out_specs=o_spec),
                compiler_params=cparams,
            )(patches, w_mat, scale, shift)

    out = out_mat[:m, :c_out].reshape(n, ho, wo, c_out)
    if out_layout == "NHWC":
        return out          # chained layers can consume NHWC directly
    return out.transpose(0, 3, 1, 2)


# ----------------------------------------------------------------------------
# Pure-JAX reference (mirrors PyTorch semantics) for verification.
# cast_bf16=True emulates the kernel's bf16 matmul inputs (f32 accumulation).
# ----------------------------------------------------------------------------
def _reference(x, weight, gamma, beta, *, bn=True, eps=1e-5, slope=0.2,
               cast_bf16=True):
    if cast_bf16:
        xc, wc = x.astype(jnp.bfloat16), weight.astype(jnp.bfloat16)
    else:
        xc, wc = x, weight
    y = jax.lax.conv_general_dilated(
        xc, wc, window_strides=(2, 2), padding=((1, 1), (1, 1)),
        dimension_numbers=("NCHW", "OIHW", "NCHW"),
        preferred_element_type=jnp.float32)
    if bn:
        mean = jnp.mean(y, axis=(0, 2, 3), keepdims=True)
        var = jnp.mean((y - mean) ** 2, axis=(0, 2, 3), keepdims=True)
        g = gamma.reshape(1, -1, 1, 1)
        b = beta.reshape(1, -1, 1, 1)
        y = (y - mean) * jax.lax.rsqrt(var + eps) * g + b
    return jnp.where(y > 0, y, slope * y)


if __name__ == "__main__":
    key = jax.random.PRNGKey(0)
    kx, kw, kg, kb = jax.random.split(key, 4)

    # Small shapes: batch=2, in_ch=4, out_ch=8, spatial=16 -> output 8x8.
    N, C_IN, C_OUT, H, W = 2, 4, 8, 16, 16

    x = jax.random.normal(kx, (N, C_IN, H, W), dtype=jnp.float32)
    # DCGAN-style deterministic weight init (normal, std 0.02).
    weight = 0.02 * jax.random.normal(kw, (C_OUT, C_IN, 4, 4),
                                      dtype=jnp.float32)
    gamma = 1.0 + 0.1 * jax.random.normal(kg, (C_OUT,), dtype=jnp.float32)
    beta = 0.1 * jax.random.normal(kb, (C_OUT,), dtype=jnp.float32)

    # bn=True, auto path (small K -> pass 2 recomputes the matmul, no
    # conv intermediate ever hits HBM).
    out = jax.block_until_ready(
        dcgan_discriminator_conv(x, weight, gamma, beta, bn=True))
    assert out.shape == (N, C_OUT, H // 2, W // 2)

    # Tight check vs a reference using the same bf16 matmul inputs.
    ref = _reference(x, weight, gamma, beta, bn=True, cast_bf16=True)
    assert jnp.allclose(out, ref, atol=1e-3, rtol=1e-3), (
        float(jnp.max(jnp.abs(out - ref))))
    # Loose sanity check vs the full-f32 (PyTorch-exact) reference; the only
    # difference is bf16 quantization of the matmul inputs.
    ref32 = _reference(x, weight, gamma, beta, bn=True, cast_bf16=False)
    assert jnp.allclose(out, ref32, atol=1e-1, rtol=1e-1), (
        float(jnp.max(jnp.abs(out - ref32))))

    # bn=True with the stored bf16 conv intermediate (large-K code path),
    # NHWC output layout.
    out_nhwc = jax.block_until_ready(
        dcgan_discriminator_conv(x, weight, gamma, beta, bn=True,
                                 out_layout="NHWC", store_conv=True))
    out_st = jnp.transpose(out_nhwc, (0, 3, 1, 2))
    assert out_st.shape == out.shape
    assert jnp.allclose(out_st, ref, atol=5e-2, rtol=5e-2), (
        float(jnp.max(jnp.abs(out_st - ref))))

    # bn=False: single fused matmul + LeakyReLU pass.
    out_nb = jax.block_until_ready(
        dcgan_discriminator_conv(x, weight, bn=False))
    ref_nb = _reference(x, weight, gamma, beta, bn=False, cast_bf16=True)
    assert jnp.allclose(out_nb, ref_nb, atol=1e-3, rtol=1e-3), (
        float(jnp.max(jnp.abs(out_nb - ref_nb))))

    print("KERNEL_OK")
</pallas_src>

<mosaic_0001>
module attributes {stable_mosaic.version = 11 : i64} {
  func.func @_conv_stats_only_kernel(%arg0: i32, %arg1: i32, %arg2: memref<64x128xbf16, #tpu.memory_space<vmem>>, %arg3: memref<128x128xbf16, #tpu.memory_space<vmem>>, %arg4: memref<8x128xf32, #tpu.memory_space<vmem>>, %arg5: memref<8x128xf32, #tpu.memory_space<vmem>>) attributes {dimension_semantics = [#tpu.dimension_semantics<parallel>, #tpu.dimension_semantics<parallel>], iteration_bounds = array<i64: 2, 1>, scalar_prefetch = 0 : i64, scratch_operands = 0 : i64, tpu.core_type = #tpu.core_type<tc>, window_params = [{transform_indices = @transform_0, window_bounds = array<i64: 64, 128>}, {transform_indices = @transform_1, window_bounds = array<i64: 128, 128>}, {transform_indices = @transform_2, window_bounds = array<i64: 8, 128>}, {transform_indices = @transform_3, window_bounds = array<i64: 8, 128>}]} {
    %c0 = arith.constant 0 : index
    %c0_0 = arith.constant 0 : index
    %0 = vector.load %arg2[%c0, %c0_0] : memref<64x128xbf16, #tpu.memory_space<vmem>>, vector<64x128xbf16>
    %c0_1 = arith.constant 0 : index
    %c0_2 = arith.constant 0 : index
    %1 = vector.load %arg3[%c0_1, %c0_2] : memref<128x128xbf16, #tpu.memory_space<vmem>>, vector<128x128xbf16>
    %cst = arith.constant dense<0.000000e+00> : vector<64x128xf32>
    %2 = tpu.matmul %0, %1, %cst {dimension_numbers = #tpu.dot_dimension_numbers<[1], [0], [0], [1], [0, 0, 1, 1], [], []>} : vector<64x128xbf16>, vector<128x128xbf16>, vector<64x128xf32> -> vector<64x128xf32>
    %3 = vector.shape_cast %2 : vector<64x128xf32> to vector<8x8x128xf32>
    %cst_3 = arith.constant dense<0.000000e+00> : vector<8x128xf32>
    %4 = vector.multi_reduction <add>, %3, %cst_3 [0] : vector<8x8x128xf32> to vector<8x128xf32>
    %c0_4 = arith.constant 0 : index
    %c0_5 = arith.constant 0 : index
    %5 = vector.load %arg4[%c0_4, %c0_5] : memref<8x128xf32, #tpu.memory_space<vmem>>, vector<8x128xf32>
    tpu.vector_store %arg4[%c0_4, %c0_5], %4 {strides = array<i32>} : memref<8x128xf32, #tpu.memory_space<vmem>>, vector<8x128xf32>,
    %6 = arith.mulf %3, %3 : vector<8x8x128xf32>
    %cst_6 = arith.constant dense<0.000000e+00> : vector<8x128xf32>
    %7 = vector.multi_reduction <add>, %6, %cst_6 [0] : vector<8x8x128xf32> to vector<8x128xf32>
    %c0_7 = arith.constant 0 : index
    %c0_8 = arith.constant 0 : index
    %8 = vector.load %arg5[%c0_7, %c0_8] : memref<8x128xf32, #tpu.memory_space<vmem>>, vector<8x128xf32>
    tpu.vector_store %arg5[%c0_7, %c0_8], %7 {strides = array<i32>} : memref<8x128xf32, #tpu.memory_space<vmem>>, vector<8x128xf32>,
    return
  }
  func.func @transform_0(%arg0: i32, %arg1: i32) -> (i32, i32) {
    %c0_i32 = arith.constant 0 : i32
    %c0_i32_0 = arith.constant 0 : i32
    return %arg0, %c0_i32 : i32, i32
  }
  func.func @transform_1(%arg0: i32, %arg1: i32) -> (i32, i32) {
    %c0_i32 = arith.constant 0 : i32
    %c0_i32_0 = arith.constant 0 : i32
    return %c0_i32, %arg1 : i32, i32
  }
  func.func @transform_2(%arg0: i32, %arg1: i32) -> (i32, i32) {
    %c0_i32 = arith.constant 0 : i32
    return %arg0, %arg1 : i32, i32
  }
  func.func @transform_3(%arg0: i32, %arg1: i32) -> (i32, i32) {
    %c0_i32 = arith.constant 0 : i32
    return %arg0, %arg1 : i32, i32
  }
}

module attributes {stable_mosaic.version = 11 : i64} {
  func.func @_conv_scale_shift_lrelu_kernel(%arg0: i32, %arg1: i32, %arg2: memref<64x128xbf16, #tpu.memory_space<vmem>>, %arg3: memref<128x128xbf16, #tpu.memory_space<vmem>>, %arg4: memref<1x128xf32, #tpu.memory_space<vmem>>, %arg5: memref<1x128xf32, #tpu.memory_space<vmem>>, %arg6: memref<64x128xf32, #tpu.memory_space<vmem>>) attributes {dimension_semantics = [#tpu.dimension_semantics<parallel>, #tpu.dimension_semantics<parallel>], iteration_bounds = array<i64: 2, 1>, scalar_prefetch = 0 : i64, scratch_operands = 0 : i64, tpu.core_type = #tpu.core_type<tc>, window_params = [{transform_indices = @transform_0, window_bounds = array<i64: 64, 128>}, {transform_indices = @transform_1, window_bounds = array<i64: 128, 128>}, {transform_indices = @transform_2, window_bounds = array<i64: 1, 128>}, {transform_indices = @transform_3, window_bounds = array<i64: 1, 128>}, {transform_indices = @transform_4, window_bounds = array<i64: 64, 128>}]} {
    %c0 = arith.constant 0 : index
    %c0_0 = arith.constant 0 : index
    %0 = vector.load %arg2[%c0, %c0_0] : memref<64x128xbf16, #tpu.memory_space<vmem>>, vector<64x128xbf16>
    %c0_1 = arith.constant 0 : index
    %c0_2 = arith.constant 0 : index
    %1 = vector.load %arg3[%c0_1, %c0_2] : memref<128x128xbf16, #tpu.memory_space<vmem>>, vector<128x128xbf16>
    %cst = arith.constant dense<0.000000e+00> : vector<64x128xf32>
    %2 = tpu.matmul %0, %1, %cst {dimension_numbers = #tpu.dot_dimension_numbers<[1], [0], [0], [1], [0, 0, 1, 1], [], []>} : vector<64x128xbf16>, vector<128x128xbf16>, vector<64x128xf32> -> vector<64x128xf32>
    %c0_3 = arith.constant 0 : index
    %c0_4 = arith.constant 0 : index
    %3 = vector.load %arg4[%c0_3, %c0_4] : memref<1x128xf32, #tpu.memory_space<vmem>>, vector<1x128xf32>
    %4 = vector.broadcast %3 : vector<1x128xf32> to vector<64x128xf32>
    %5 = arith.mulf %2, %4 : vector<64x128xf32>
    %c0_5 = arith.constant 0 : index
    %c0_6 = arith.constant 0 : index
    %6 = vector.load %arg5[%c0_5, %c0_6] : memref<1x128xf32, #tpu.memory_space<vmem>>, vector<1x128xf32>
    %7 = vector.broadcast %6 : vector<1x128xf32> to vector<64x128xf32>
    %8 = arith.addf %5, %7 : vector<64x128xf32>
    %cst_7 = arith.constant 0.000000e+00 : f32
    %9 = vector.broadcast %cst_7 : f32 to vector<64x128xf32>
    %10 = arith.cmpf ogt, %8, %9 : vector<64x128xf32>
    %cst_8 = arith.constant 2.000000e-01 : f32
    %11 = vector.broadcast %cst_8 : f32 to vector<64x128xf32>
    %12 = arith.mulf %11, %8 : vector<64x128xf32>
    %13 = arith.select %10, %8, %12 : vector<64x128xi1>, vector<64x128xf32>
    %c0_9 = arith.constant 0 : index
    %c0_10 = arith.constant 0 : index
    %14 = vector.load %arg6[%c0_9, %c0_10] : memref<64x128xf32, #tpu.memory_space<vmem>>, vector<64x128xf32>
    tpu.vector_store %arg6[%c0_9, %c0_10], %13 {strides = array<i32>} : memref<64x128xf32, #tpu.memory_space<vmem>>, vector<64x128xf32>,
    return
  }
  func.func @transform_0(%arg0: i32, %arg1: i32) -> (i32, i32) {
    %c0_i32 = arith.constant 0 : i32
    %c0_i32_0 = arith.constant 0 : i32
    return %arg0, %c0_i32 : i32, i32
  }
  func.func @transform_1(%arg0: i32, %arg1: i32) -> (i32, i32) {
    %c0_i32 = arith.constant 0 : i32
    %c0_i32_0 = arith.constant 0 : i32
    return %c0_i32, %arg1 : i32, i32
  }
  func.func @transform_2(%arg0: i32, %arg1: i32) -> (i32, i32) {
    %c0_i32 = arith.constant 0 : i32
    %c0_i32_0 = arith.constant 0 : i32
    return %c0_i32, %arg1 : i32, i32
  }
  func.func @transform_3(%arg0: i32, %arg1: i32) -> (i32, i32) {
    %c0_i32 = arith.constant 0 : i32
    %c0_i32_0 = arith.constant 0 : i32
    return %c0_i32, %arg1 : i32, i32
  }
  func.func @transform_4(%arg0: i32, %arg1: i32) -> (i32, i32) {
    %c0_i32 = arith.constant 0 : i32
    return %arg0, %arg1 : i32, i32
  }
}

</mosaic_0001>

<bundles_post_ra>
// kernel: dcgan_discriminator_conv.3
= control target key start
LH: loop header
LB: loop body
LE: loop exit
PB: predicated region body
PF: predicated region fallthrough
CT: control target
= control target key end

     0   :  { %s769_s15 = smov 0   ;;  %s771_s16 = smov 0   ;;  %s852_s0 = inlined_call_operand.vmem [shape: bf16[128,128], index: 0, kind: input, shape index: {}]   ;;  %s853_s1 = inlined_call_operand.vmem [shape: bf16[128,128], index: 1, kind: input, shape index: {}]   ;;  %s854_s2 = inlined_call_operand.vmem [shape: f32[1,128], index: 2, kind: input, shape index: {}]   ;;  %s855_s3 = inlined_call_operand.vmem [shape: f32[1,128], index: 3, kind: input, shape index: {}]   ;;  %s856_s4 = inlined_call_operand.vmem [shape: f32[128,128], index: 4, kind: output, shape index: {}]  }
   0x1   :  { %s773_s17 = smov 0  }
   0x2 LB: > { %s26_s18 = sadd.s32 1, %s738_s16  ;;  %p611_p0 = scmp.ge.s32.totalorder %s742_s17, 1  ;;  %s742_s17 = sphi %s773_s17, %s14_s17   ;;  %s738_s16 = sphi %s771_s16, %s858_s16   ;;  %s734_s15 = sphi %s769_s15, %s857_s15  }
   0x3   : > { %p28_p1 = scmp.ge.s32.totalorder %s26_s18, 2  ;;  %p202_p2 = scmp.lt.s32.totalorder %s742_s17, 3 }
   0x5   : > { %s860_s18 = smov (%p28_p1, %s26_s18), 0  ;;  %p203_p3 = pnand %p611_p0, %p202_p2 }
   0x6   : > { %v708_v0 = vld [vmem:[%s853_s1] sm:$0xff] (!%p203_p3)   ;;  %s612_s21 = sshll.u32 (!%p203_p3), %s734_s15, 3  ;;  %v709_v1 = vld [vmem:[%s853_s1 + $0x8] sm:$0xff] (!%p203_p3)   ;;  %v710_v2 = vld [vmem:[%s853_s1 + $0x10] sm:$0xff] (!%p203_p3)  }
   0x7   : > { %206 = sbr.rel (%p203_p3) target bundleno = 265 (0x109), region = 36  ;;  %p242_p4 = scmp.lt.s32.totalorder (!%p203_p3), %s612_s21, 15  ;;  %644 = vmatprep.subr.bf16.mxu0 (!%p203_p3), %v708_v0  ;;  %668 = vmatprep.subr.bf16.mxu1 (!%p203_p3), %v708_v0  ;;  %v711_v3 = vld [vmem:[%s853_s1 + $0x18] sm:$0xff] (!%p203_p3)   ;;  %v712_v6 = vld [vmem:[%s853_s1 + $0x20] sm:$0xff] (!%p203_p3)   ;;  %v713_v7 = vld [vmem:[%s853_s1 + $0x28] sm:$0xff] (!%p203_p3)  }
   0x8   : > { %645 = vmatpush3.bf16.msra.mxu0 (!%p203_p3), %v708_v0  ;;  %676 = vmatpush3.bf16.msra.mxu1 (!%p203_p3), %v708_v0  ;;  %v714_v8 = vld [vmem:[%s853_s1 + $0x30] sm:$0xff] (!%p203_p3)   ;;  %v715_v9 = vld [vmem:[%s853_s1 + $0x38] sm:$0xff] (!%p203_p3)   ;;  %v628_v12 = vld [vmem:[%s854_s2] ss:$0 sm:$0xff] (!%p203_p3) }
   0x9   : > { %646 = vmatprep.subr.bf16.mxu0 (!%p203_p3), %v709_v1  ;;  %669 = vmatprep.subr.bf16.mxu1 (!%p203_p3), %v709_v1  ;;  %v629_v14 = vld [vmem:[%s855_s3] ss:$0 sm:$0xff] (!%p203_p3) }
   0xc   : > { %647 = vmatpush3.bf16.msra.mxu0 (!%p203_p3), %v709_v1  ;;  %677 = vmatpush3.bf16.msra.mxu1 (!%p203_p3), %v709_v1 }
   0xd   : > { %648 = vmatprep.subr.bf16.mxu0 (!%p203_p3), %v710_v2  ;;  %670 = vmatprep.subr.bf16.mxu1 (!%p203_p3), %v710_v2 }
   0xe   : > { %s862_s21 = smov (!%p242_p4, %s612_s21), 15 }
   0xf   : > { %s613_s26 = sshll.u32 %s862_s21, 2  ;;  %s615_s22 = sshll.u32 %s862_s21, 3 }
  0x10   : > { %s802_s29 = scalar_lea.vmem %s852_s0, %s613_s26  ;;  %649 = vmatpush3.bf16.msra.mxu0 %v710_v2  ;;  %678 = vmatpush3.bf16.msra.mxu1 %v710_v2  ;;  %s833_s25 = scalar_lea.vmem %s856_s4, %s615_s22 }
  0x11   : > { %v716_v4 = vld [vmem:[%s802_s29] sm:$0xff]   ;;  %v717_v5 = vld [vmem:[%s802_s29 + $0x10] sm:$0xff]   ;;  %650 = vmatprep.subr.bf16.mxu0 %v711_v3  ;;  %671 = vmatprep.subr.bf16.mxu1 %v711_v3  ;;  %v718_v10 = vld [vmem:[%s802_s29 + $0x8] sm:$0xff]  }
  0x12   : > { %660 = vmatprep.mubr.bf16.mxu0 %v716_v4  ;;  %664 = vmatprep.mubr.bf16.mxu1 %v717_v5  ;;  %v719_v11 = vld [vmem:[%s802_s29 + $0x18] sm:$0xff]  }
  0x14   : > { %651 = vmatpush3.bf16.msra.mxu0 %v711_v3  ;;  %679 = vmatpush3.bf16.msra.mxu1 %v711_v3 }
  0x15   : > { %652 = vmatprep.subr.bf16.mxu0 %v712_v6  ;;  %672 = vmatprep.subr.bf16.mxu1 %v712_v6 }
  0x18   : > { %653 = vmatpush3.bf16.msra.mxu0 %v712_v6  ;;  %680 = vmatpush3.bf16.msra.mxu1 %v712_v6 }
  0x19   : > { %654 = vmatprep.subr.bf16.mxu0 %v713_v7  ;;  %673 = vmatprep.subr.bf16.mxu1 %v713_v7 }
  0x1c   : > { %655 = vmatpush3.bf16.msra.mxu0 %v713_v7  ;;  %681 = vmatpush3.bf16.msra.mxu1 %v713_v7 }
  0x1d   : > { %656 = vmatprep.subr.bf16.mxu0 %v714_v8  ;;  %674 = vmatprep.subr.bf16.mxu1 %v714_v8 }
  0x20   : > { %657 = vmatpush3.bf16.msra.mxu0 %v714_v8  ;;  %682 = vmatpush3.bf16.msra.mxu1 %v714_v8 }
  0x21   : > { %658 = vmatprep.subr.bf16.mxu0 %v715_v9  ;;  %675 = vmatprep.subr.bf16.mxu1 %v715_v9 }
  0x24   : > { %659 = vmatpush3.bf16.msra.mxu0 %v715_v9  ;;  %683 = vmatpush3.bf16.msra.mxu1 %v715_v9 }
  0x27   : > { %661 = vmatmul.mubr.bf16.vlgmr.msra.gmra.mrb[0].mxu0 %v718_v10  ;;  %665 = vmatmul.mubr.bf16.vlgmr.msra.gmra.mrb[0].mxu1 %v719_v11 }
  0xfa   : > { %v662_v13 = vpop.f32.mrb[0].mxu0  ;;  %v666_v15 = vpop.f32.mrb[0].mxu1 }
  0xfb   : > { %v437_v16 = vmul.f32 %v662_v13, %v628_v12  ;;  %v441_v17 = vmul.f32 %v666_v15, %v628_v12  ;;  %v397_v18 = vpop.f32.mrb[1].mxu0  ;;  %v413_v19 = vpop.f32.mrb[1].mxu1 }
  0xfc   : > { %v435_v20 = vmul.f32 %v628_v12, %v397_v18  ;;  %v439_v21 = vmul.f32 %v628_v12, %v413_v19  ;;  %v663_v22 = vpop.f32.mrb[2].mxu0  ;;  %v667_v23 = vpop.f32.mrb[2].mxu1 }
  0xfd   : > { %v452_v24 = vadd.f32 %v629_v14, %v437_v16  ;;  %v456_v25 = vadd.f32 %v629_v14, %v441_v17  ;;  %v438_v26 = vmul.f32 %v663_v22, %v628_v12  ;;  %v442_v27 = vmul.f32 %v667_v23, %v628_v12  ;;  %v400_v28 = vpop.f32.mrb[3].mxu0  ;;  %v416_v29 = vpop.f32.mrb[3].mxu1 }
  0xfe   : > { %v450_v30 = vadd.f32 %v629_v14, %v435_v20  ;;  %v454_v31 = vadd.f32 %v629_v14, %v439_v21  ;;  %v436_v32 = vmul.f32 %v628_v12, %v400_v28  ;;  %v440_v33 = vmul.f32 %v628_v12, %v416_v29 }
  0xff   : > { %vm460_vm0 = vcmp.gt.f32.partialorder %v452_v24, 0.0  ;;  %v468_v34 = vmul.f32 0.2, %v452_v24  ;;  %vm464_vm1 = vcmp.gt.f32.partialorder %v456_v25, 0.0  ;;  %v472_v35 = vmul.f32 0.2, %v456_v25 }
 0x100   : > { %vm458_vm2 = vcmp.gt.f32.partialorder %v450_v30, 0.0  ;;  %v466_v36 = vmul.f32 0.2, %v450_v30  ;;  %vm462_vm3 = vcmp.gt.f32.partialorder %v454_v31, 0.0  ;;  %v470_v37 = vmul.f32 0.2, %v454_v31 }
 0x101   : > { %v476_v38 = vsel %vm460_vm0, %v452_v24, %v468_v34  ;;  %v480_v39 = vsel %vm464_vm1, %v456_v25, %v472_v35  ;;  %v453_v40 = vadd.f32 %v629_v14, %v438_v26  ;;  %v457_v41 = vadd.f32 %v629_v14, %v442_v27 }
 0x102   : > { %484 = vst [vmem:[%s833_s25 + $0x10] sm:$0xff] %v476_v38  ;;  %488 = vst [vmem:[%s833_s25 + $0x30] sm:$0xff] %v480_v39  ;;  %v474_v42 = vsel %vm458_vm2, %v450_v30, %v466_v36  ;;  %v478_v43 = vsel %vm462_vm3, %v454_v31, %v470_v37  ;;  %v451_v44 = vadd.f32 %v629_v14, %v436_v32 }
 0x103   : > { %v455_v45 = vadd.f32 %v629_v14, %v440_v33  ;;  %482 = vst [vmem:[%s833_s25] sm:$0xff] %v474_v42  ;;  %486 = vst [vmem:[%s833_s25 + $0x20] sm:$0xff] %v478_v43  ;;  %vm461_vm4 = vcmp.gt.f32.partialorder %v453_v40, 0.0  ;;  %v469_v46 = vmul.f32 0.2, %v453_v40  ;;  %vm465_vm5 = vcmp.gt.f32.partialorder %v457_v41, 0.0 }
 0x104   : > { %v473_v47 = vmul.f32 0.2, %v457_v41  ;;  %vm459_vm6 = vcmp.gt.f32.partialorder %v451_v44, 0.0  ;;  %v467_v48 = vmul.f32 0.2, %v451_v44 }
 0x105   : > { %vm463_vm7 = vcmp.gt.f32.partialorder %v455_v45, 0.0  ;;  %v471_v49 = vmul.f32 0.2, %v455_v45  ;;  %v477_v50 = vsel %vm461_vm4, %v453_v40, %v469_v46 }
 0x106   : > { %v481_v51 = vsel %vm465_vm5, %v457_v41, %v473_v47  ;;  %485 = vst [vmem:[%s833_s25 + $0x18] sm:$0xff] %v477_v50  ;;  %v475_v52 = vsel %vm459_vm6, %v451_v44, %v467_v48 }
 0x107   : > { %489 = vst [vmem:[%s833_s25 + $0x38] sm:$0xff] %v481_v51  ;;  %v479_v53 = vsel %vm463_vm7, %v455_v45, %v471_v49  ;;  %483 = vst [vmem:[%s833_s25 + $0x8] sm:$0xff] %v475_v52 }
 0x108   : > { %487 = vst [vmem:[%s833_s25 + $0x28] sm:$0xff] %v479_v53 }
 0x109 PF: > { %s14_s17 = sadd.s32 1, %s742_s17   ;;  %s857_s15 = smov %s738_s16 }
 0x10a   : > { %p11_p5 = scmp.ge.s32.totalorder %s14_s17, 4   ;;  %s858_s16 = smov %s860_s18 }
 0x10c   :  { %13 = sbr.rel (!%p11_p5) target bundleno = 2 (0x2), region = 75 }

// kernel: dcgan_discriminator_conv.2
= control target key start
LH: loop header
LB: loop body
LE: loop exit
PB: predicated region body
PF: predicated region fallthrough
CT: control target
= control target key end

     0   :  { %s697_s12 = smov 0   ;;  %s699_s13 = smov 0   ;;  %s768_s0 = inlined_call_operand.vmem [shape: bf16[128,128], index: 0, kind: input, shape index: {}]   ;;  %s769_s1 = inlined_call_operand.vmem [shape: bf16[128,128], index: 1, kind: input, shape index: {}]   ;;  %s770_s2 = inlined_call_operand.vmem [shape: f32[16,128], index: 2, kind: output, shape index: {0}]   ;;  %s771_s3 = inlined_call_operand.vmem [shape: f32[16,128], index: 3, kind: output, shape index: {1}]  }
   0x1   :  { %s701_s14 = smov 0  }
   0x2 LB: > { %s26_s15 = sadd.s32 1, %s671_s13  ;;  %p546_p0 = scmp.ge.s32.totalorder %s675_s14, 1  ;;  %s675_s14 = sphi %s701_s14, %s14_s14   ;;  %s671_s13 = sphi %s699_s13, %s773_s13   ;;  %s667_s12 = sphi %s697_s12, %s772_s12  }
   0x3   : > { %p28_p1 = scmp.ge.s32.totalorder %s26_s15, 2  ;;  %p166_p2 = scmp.lt.s32.totalorder %s675_s14, 3 }
   0x5   : > { %s775_s15 = smov (%p28_p1, %s26_s15), 0  ;;  %p167_p3 = pnand %p546_p0, %p166_p2 }
   0x6   : > { %v641_v0 = vld [vmem:[%s769_s1] sm:$0xff] (!%p167_p3)   ;;  %s547_s18 = sshll.u32 (!%p167_p3), %s667_s12, 3  ;;  %v642_v1 = vld [vmem:[%s769_s1 + $0x8] sm:$0xff] (!%p167_p3)   ;;  %v643_v2 = vld [vmem:[%s769_s1 + $0x10] sm:$0xff] (!%p167_p3)   ;;  %p213_p5 = scmp.lt.s32.totalorder (!%p167_p3), %s667_s12, 1 }
   0x7   : > { %170 = sbr.rel (%p167_p3) target bundleno = 271 (0x10f), region = 28  ;;  %p204_p4 = scmp.lt.s32.totalorder (!%p167_p3), %s547_s18, 15  ;;  %577 = vmatprep.subr.bf16.mxu0 (!%p167_p3), %v641_v0  ;;  %601 = vmatprep.subr.bf16.mxu1 (!%p167_p3), %v641_v0  ;;  %v644_v3 = vld [vmem:[%s769_s1 + $0x18] sm:$0xff] (!%p167_p3)   ;;  %v645_v6 = vld [vmem:[%s769_s1 + $0x20] sm:$0xff] (!%p167_p3)   ;;  %v646_v7 = vld [vmem:[%s769_s1 + $0x28] sm:$0xff] (!%p167_p3)  }
   0x8   : > { %578 = vmatpush3.bf16.msra.mxu0 (!%p167_p3), %v641_v0  ;;  %609 = vmatpush3.bf16.msra.mxu1 (!%p167_p3), %v641_v0  ;;  %v647_v8 = vld [vmem:[%s769_s1 + $0x30] sm:$0xff] (!%p167_p3)   ;;  %v648_v9 = vld [vmem:[%s769_s1 + $0x38] sm:$0xff] (!%p167_p3)  }
   0x9   : > { %579 = vmatprep.subr.bf16.mxu0 (!%p167_p3), %v642_v1  ;;  %602 = vmatprep.subr.bf16.mxu1 (!%p167_p3), %v642_v1 }
   0xc   : > { %580 = vmatpush3.bf16.msra.mxu0 (!%p167_p3), %v642_v1  ;;  %610 = vmatpush3.bf16.msra.mxu1 (!%p167_p3), %v642_v1 }
   0xd   : > { %581 = vmatprep.subr.bf16.mxu0 (!%p167_p3), %v643_v2  ;;  %603 = vmatprep.subr.bf16.mxu1 (!%p167_p3), %v643_v2 }
   0xe   : > { %s777_s18 = smov (!%p204_p4, %s547_s18), 15  ;;  %s779_s12 = smov (!%p213_p5, %s667_s12), 1 }
   0xf   : > { %s548_s23 = sshll.u32 %s777_s18, 2  ;;  %s549_s10 = sshll.u32 %s779_s12, 3 }
  0x10   : > { %s730_s26 = scalar_lea.vmem %s768_s0, %s548_s23  ;;  %582 = vmatpush3.bf16.msra.mxu0 %v643_v2  ;;  %611 = vmatpush3.bf16.msra.mxu1 %v643_v2  ;;  %s219_s17 = scalar_lea.vmem %s770_s2, %s549_s10 }
  0x11   : > { %v649_v4 = vld [vmem:[%s730_s26] sm:$0xff]   ;;  %v651_v5 = vld [vmem:[%s730_s26 + $0x10] sm:$0xff]   ;;  %583 = vmatprep.subr.bf16.mxu0 %v644_v3  ;;  %604 = vmatprep.subr.bf16.mxu1 %v644_v3  ;;  %v650_v10 = vld [vmem:[%s730_s26 + $0x8] sm:$0xff]   ;;  %s226_s20 = scalar_lea.vmem %s771_s3, %s549_s10 }
  0x12   : > { %593 = vmatprep.mubr.bf16.mxu0 %v649_v4  ;;  %597 = vmatprep.mubr.bf16.mxu1 %v651_v5  ;;  %v652_v11 = vld [vmem:[%s730_s26 + $0x18] sm:$0xff]  }
  0x14   : > { %584 = vmatpush3.bf16.msra.mxu0 %v644_v3  ;;  %612 = vmatpush3.bf16.msra.mxu1 %v644_v3 }
  0x15   : > { %585 = vmatprep.subr.bf16.mxu0 %v645_v6  ;;  %605 = vmatprep.subr.bf16.mxu1 %v645_v6 }
  0x18   : > { %586 = vmatpush3.bf16.msra.mxu0 %v645_v6  ;;  %613 = vmatpush3.bf16.msra.mxu1 %v645_v6 }
  0x19   : > { %587 = vmatprep.subr.bf16.mxu0 %v646_v7  ;;  %606 = vmatprep.subr.bf16.mxu1 %v646_v7 }
  0x1c   : > { %588 = vmatpush3.bf16.msra.mxu0 %v646_v7  ;;  %614 = vmatpush3.bf16.msra.mxu1 %v646_v7 }
  0x1d   : > { %589 = vmatprep.subr.bf16.mxu0 %v647_v8  ;;  %607 = vmatprep.subr.bf16.mxu1 %v647_v8 }
  0x20   : > { %590 = vmatpush3.bf16.msra.mxu0 %v647_v8  ;;  %615 = vmatpush3.bf16.msra.mxu1 %v647_v8 }
  0x21   : > { %591 = vmatprep.subr.bf16.mxu0 %v648_v9  ;;  %608 = vmatprep.subr.bf16.mxu1 %v648_v9 }
  0x24   : > { %592 = vmatpush3.bf16.msra.mxu0 %v648_v9  ;;  %616 = vmatpush3.bf16.msra.mxu1 %v648_v9 }
  0x27   : > { %594 = vmatmul.mubr.bf16.vlgmr.msra.gmra.mrb[0].mxu0 %v650_v10  ;;  %598 = vmatmul.mubr.bf16.vlgmr.msra.gmra.mrb[0].mxu1 %v652_v11 }
  0xfa   : > { %v595_v12 = vpop.f32.mrb[0].mxu0  ;;  %v599_v13 = vpop.f32.mrb[0].mxu1 }
  0xfb   : > { %v358_v14 = vpop.f32.mrb[1].mxu0  ;;  %v374_v15 = vpop.f32.mrb[1].mxu1  ;;  %v399_v23 = vmul.f32 %v595_v12, %v595_v12  ;;  %v403_v35 = vmul.f32 %v599_v13, %v599_v13 }
  0xfc   : > { %v596_v16 = vpop.f32.mrb[2].mxu0  ;;  %v600_v17 = vpop.f32.mrb[2].mxu1  ;;  %v397_v20 = vmul.f32 %v358_v14, %v358_v14  ;;  %v401_v29 = vmul.f32 %v374_v15, %v374_v15 }
  0xfd   : > { %v361_v18 = vpop.f32.mrb[3].mxu0  ;;  %v377_v19 = vpop.f32.mrb[3].mxu1  ;;  %v400_v26 = vmul.f32 %v596_v16, %v596_v16  ;;  %v404_v38 = vmul.f32 %v600_v17, %v600_v17 }
  0xfe   : > { %v389_v21 = vadd.f32 %v361_v18, %v358_v14  ;;  %v398_v22 = vmul.f32 %v361_v18, %v361_v18  ;;  %v402_v34 = vmul.f32 %v377_v19, %v377_v19 }
 0x100   : > { %v390_v24 = vadd.f32 %v595_v12, %v389_v21  ;;  %v405_v25 = vadd.f32 %v398_v22, %v397_v20 }
 0x102   : > { %v406_v27 = vadd.f32 %v405_v25, %v399_v23  ;;  %v391_v28 = vadd.f32 %v596_v16, %v390_v24 }
 0x104   : > { %v392_v30 = vadd.f32 %v391_v28, %v374_v15  ;;  %v407_v31 = vadd.f32 %v406_v27, %v400_v26 }
 0x106   : > { %v408_v32 = vadd.f32 %v407_v31, %v401_v29  ;;  %v393_v33 = vadd.f32 %v392_v30, %v377_v19 }
 0x108   : > { %v394_v36 = vadd.f32 %v599_v13, %v393_v33  ;;  %v409_v37 = vadd.f32 %v408_v32, %v402_v34 }
 0x10a   : > { %v395_v39 = vadd.f32 %v600_v17, %v394_v36  ;;  %v410_v40 = vadd.f32 %v409_v37, %v403_v35 }
 0x10c   : > { %396 = vst [vmem:[%s219_s17] sm:$0xff] %v395_v39  ;;  %v411_v41 = vadd.f32 %v410_v40, %v404_v38 }
 0x10e   : > { %412 = vst [vmem:[%s226_s20] sm:$0xff] %v411_v41 }
 0x10f PF: > { %s14_s14 = sadd.s32 1, %s675_s14   ;;  %s772_s12 = smov %s671_s13 }
 0x110   : > { %p11_p6 = scmp.ge.s32.totalorder %s14_s14, 4   ;;  %s773_s13 = smov %s775_s15 }
 0x112   :  { %13 = sbr.rel (!%p11_p6) target bundleno = 2 (0x2), region = 73 }

</bundles_post_ra>
